<compile_context>
chip_gen: v6e
topology: v6e:2x2x1
jax: 0.10.0
libtpu: 0.0.40
codegen_flags: <defaults>
</compile_context>

<pallas_src>
import jax
import jax.numpy as jnp
from jax.experimental import pallas as pl
from jax.experimental.pallas import tpu as pltpu


def _round_up(x, m):
    return ((x + m - 1) // m) * m


def _pad_axis(a, axis, target):
    pad = target - a.shape[axis]
    if pad == 0:
        return a
    widths = [(0, 0)] * a.ndim
    widths[axis] = (0, pad)
    return jnp.pad(a, widths)


def _block_stochlinear_kernel(x_ref, w_ref, wv_ref, p_ref, o_ref, acc_m, acc_v):
    """One (tm, tn) output tile, accumulated over the K (=F_in) grid axis.

    Block.forward = post(dropout(layer(act(x)))) with module defaults (act/post
    identity, dropout=0), so the hot path is exactly the StochLinear forward.
    """
    k = pl.program_id(2)

    @pl.when(k == 0)
    def _():
        acc_m[...] = jnp.zeros_like(acc_m)
        acc_v[...] = jnp.zeros_like(acc_v)

    x = x_ref[...]                                 # f32 (tm, tk)
    # Square in f32 on the VPU (free under MXU slack; no bf16 VPU on v5e),
    # then cast both MXU operands to the streamed weight dtype (bf16).
    xm = x.astype(w_ref.dtype)
    xv = (x * x).astype(wv_ref.dtype)
    acc_m[...] += jnp.dot(xm, w_ref[...], preferred_element_type=jnp.float32)
    acc_v[...] += jnp.dot(xv, wv_ref[...], preferred_element_type=jnp.float32)

    @pl.when(k == pl.num_programs(2) - 1)
    def _():
        bias = p_ref[0:1, :]                       # (1, tn), broadcast over batch
        bvar = p_ref[1:2, :]
        noise = p_ref[2:3, :]
        m = acc_m[...] + bias
        a2 = acc_v[...] + bvar                     # >= 0 by construction -> sqrt safe
        o_ref[...] = (jnp.sqrt(a2) * noise + m).astype(o_ref.dtype)


def block_forward(x, weight, weight_var, bias, bias_var, noise,
                  matmul_dtype=jnp.bfloat16):
    """Block(StochLinear) forward.

    x          : [B, F_in]      float32
    weight     : [F_out, F_in]  (PyTorch nn.Linear layout)
    weight_var : [F_out, F_in]  weight_std**2
    bias       : [F_out]
    bias_var   : [F_out]        bias_std**2
    noise      : [F_out]        standard-normal draw (the `N` in StochLinear)
    """
    B, F_in = x.shape
    F_out, F_in_w = weight.shape
    assert F_in_w == F_in and weight_var.shape == weight.shape

    # ---- tile selection (output lane-dense: F_out padded to multiples of 128) ----
    B_pad = _round_up(B, 8) if B <= 128 else _round_up(B, 128)
    tm = min(B_pad, 128)
    K_pad = _round_up(F_in, 128)
    tk = next(t for t in (512, 384, 256, 128) if K_pad % t == 0)
    N_pad = _round_up(F_out, 128)
    tn = next(t for t in (512, 384, 256, 128) if N_pad % t == 0)

    # ---- pad + layout (zero padding contributes 0 to both matmul paths) ----
    xp = _pad_axis(_pad_axis(x.astype(jnp.float32), 0, B_pad), 1, K_pad)
    w_t = _pad_axis(_pad_axis(weight.T, 0, K_pad), 1, N_pad).astype(matmul_dtype)
    wv_t = _pad_axis(_pad_axis(weight_var.T, 0, K_pad), 1, N_pad).astype(matmul_dtype)
    params = jnp.stack([
        _pad_axis(bias.astype(jnp.float32), 0, N_pad),
        _pad_axis(bias_var.astype(jnp.float32), 0, N_pad),
        _pad_axis(noise.astype(jnp.float32), 0, N_pad),
    ])                                              # (3, N_pad): one DMA, not three

    grid = (B_pad // tm, N_pad // tn, K_pad // tk)

    out = pl.pallas_call(
        _block_stochlinear_kernel,
        out_shape=jax.ShapeDtypeStruct((B_pad, N_pad), jnp.float32),
        grid_spec=pltpu.PrefetchScalarGridSpec(
            num_scalar_prefetch=0,
            grid=grid,
            in_specs=[
                pl.BlockSpec((tm, tk), lambda i, j, k: (i, k)),   # x
                pl.BlockSpec((tk, tn), lambda i, j, k: (k, j)),   # W^T (bf16 stream)
                pl.BlockSpec((tk, tn), lambda i, j, k: (k, j)),   # Wvar^T (bf16 stream)
                pl.BlockSpec((3, tn), lambda i, j, k: (0, j)),    # packed b / bvar / noise
            ],
            out_specs=pl.BlockSpec((tm, tn), lambda i, j, k: (i, j)),
            scratch_shapes=[pltpu.VMEM((tm, tn), jnp.float32),    # mean accumulator
                            pltpu.VMEM((tm, tn), jnp.float32)],   # variance accumulator
        ),
        compiler_params=pltpu.CompilerParams(
            dimension_semantics=("parallel", "parallel", "arbitrary"),
            vmem_limit_bytes=32 * 1024 * 1024,
        ),
    )(xp, w_t, wv_t, params)

    return out[:B, :F_out]


def _var_to_rho(var):
    return var ** (1.0 / 3.0)


def _rho_to_std(rho):
    return jnp.abs(rho) ** 1.5


if __name__ == "__main__":
    key = jax.random.PRNGKey(0)
    k_x, k_w, k_b, k_n = jax.random.split(key, 4)

    B, F_in, F_out = 8, 32, 64          # small shapes consistent with nn.Linear
    weight_v = bias_v = 0.01            # StochLinear defaults

    # Deterministic "mother" nn.Linear parameters (synthetic init, not a checkpoint).
    weight = jax.random.normal(k_w, (F_out, F_in), dtype=jnp.float32) * 0.1   # [out, in]
    bias = jax.random.normal(k_b, (F_out,), dtype=jnp.float32) * 0.1

    # rho buffers: filled with var**(1/3); std = |rho|**1.5 = sqrt(var)
    weight_rho = jnp.full((F_out, F_in), _var_to_rho(weight_v), dtype=jnp.float32)
    bias_rho = jnp.full((F_out,), _var_to_rho(bias_v), dtype=jnp.float32)
    weight_var = jnp.square(_rho_to_std(weight_rho))    # == weight_v
    bias_var = jnp.square(_rho_to_std(bias_rho))        # == bias_v

    # Fresh standard-normal noise vector (torch.randn(out_features) equivalent).
    noise = jax.random.normal(k_n, (F_out,), dtype=jnp.float32)
    x = jax.random.normal(k_x, (B, F_in), dtype=jnp.float32)

    out = block_forward(x, weight, weight_var, bias, bias_var, noise)
    out = jax.block_until_ready(out)
    assert out.shape == (B, F_out)

    # Reference with the same bf16 rounding of the MXU operands (f32 accumulate):
    hi = jax.lax.Precision.HIGHEST
    wb = weight.astype(jnp.bfloat16).astype(jnp.float32)
    wvb = weight_var.astype(jnp.bfloat16).astype(jnp.float32)
    xb = x.astype(jnp.bfloat16).astype(jnp.float32)
    x2b = (x * x).astype(jnp.bfloat16).astype(jnp.float32)
    M_ref = jnp.dot(xb, wb.T, precision=hi) + bias
    A_ref = jnp.sqrt(jnp.dot(x2b, wvb.T, precision=hi) + bias_var)
    ref = A_ref * noise + M_ref
    assert jnp.allclose(out, ref, atol=1e-2, rtol=1e-2), "mismatch vs bf16-consistent reference"

    # Loose check against full-f32 math, bounding the bf16 weight-streaming error.
    M32 = jnp.dot(x, weight.T, precision=hi) + bias
    A32 = jnp.sqrt(jnp.dot(x * x, weight_var.T, precision=hi) + bias_var)
    ref32 = A32 * noise + M32
    assert jnp.allclose(out, ref32, atol=5e-2, rtol=5e-2), "bf16 streaming error too large"

    # TODO(synk): Block's optional act/post callbacks and nn.Dropout (training-mode
    # Bernoulli masking) are identity at the module defaults used here.
    print("KERNEL_OK")
</pallas_src>

<mosaic_0001>
module attributes {stable_mosaic.version = 11 : i64} {
  func.func @_block_stochlinear_kernel(%arg0: i32, %arg1: i32, %arg2: i32, %arg3: memref<8x128xf32, #tpu.memory_space<vmem>>, %arg4: memref<128x128xbf16, #tpu.memory_space<vmem>>, %arg5: memref<128x128xbf16, #tpu.memory_space<vmem>>, %arg6: memref<3x128xf32, #tpu.memory_space<vmem>>, %arg7: memref<8x128xf32, #tpu.memory_space<vmem>>, %arg8: memref<8x128xf32, #tpu.memory_space<vmem>>, %arg9: memref<8x128xf32, #tpu.memory_space<vmem>>) attributes {dimension_semantics = [#tpu.dimension_semantics<parallel>, #tpu.dimension_semantics<parallel>, #tpu.dimension_semantics<arbitrary>], iteration_bounds = array<i64: 1, 1, 1>, scalar_prefetch = 0 : i64, scratch_operands = 2 : i64, tpu.core_type = #tpu.core_type<tc>, window_params = [{transform_indices = @transform_0, window_bounds = array<i64: 8, 128>}, {transform_indices = @transform_1, window_bounds = array<i64: 128, 128>}, {transform_indices = @transform_2, window_bounds = array<i64: 128, 128>}, {transform_indices = @transform_3, window_bounds = array<i64: 3, 128>}, {transform_indices = @transform_4, window_bounds = array<i64: 8, 128>}]} {
    %c0_i32 = arith.constant 0 : i32
    %0 = arith.cmpi eq, %arg2, %c0_i32 : i32
    %1 = arith.extui %0 : i1 to i32
    %c0_i32_0 = arith.constant 0 : i32
    %2 = arith.cmpi ne, %1, %c0_i32_0 : i32
    scf.if %2 {
      %cst_17 = arith.constant 0.000000e+00 : f32
      %20 = vector.broadcast %cst_17 : f32 to vector<8x128xf32>
      %c0_18 = arith.constant 0 : index
      %c0_19 = arith.constant 0 : index
      %21 = vector.load %arg8[%c0_18, %c0_19] : memref<8x128xf32, #tpu.memory_space<vmem>>, vector<8x128xf32>
      tpu.vector_store %arg8[%c0_18, %c0_19], %20 {strides = array<i32>} : memref<8x128xf32, #tpu.memory_space<vmem>>, vector<8x128xf32>,
      %cst_20 = arith.constant 0.000000e+00 : f32
      %22 = vector.broadcast %cst_20 : f32 to vector<8x128xf32>
      %c0_21 = arith.constant 0 : index
      %c0_22 = arith.constant 0 : index
      %23 = vector.load %arg9[%c0_21, %c0_22] : memref<8x128xf32, #tpu.memory_space<vmem>>, vector<8x128xf32>
      tpu.vector_store %arg9[%c0_21, %c0_22], %22 {strides = array<i32>} : memref<8x128xf32, #tpu.memory_space<vmem>>, vector<8x128xf32>,
    } else {
    }
    %c0 = arith.constant 0 : index
    %c0_1 = arith.constant 0 : index
    %3 = vector.load %arg3[%c0, %c0_1] : memref<8x128xf32, #tpu.memory_space<vmem>>, vector<8x128xf32>
    %4 = arith.truncf %3 : vector<8x128xf32> to vector<8x128xbf16>
    %5 = arith.mulf %3, %3 : vector<8x128xf32>
    %6 = arith.truncf %5 : vector<8x128xf32> to vector<8x128xbf16>
    %c0_2 = arith.constant 0 : index
    %c0_3 = arith.constant 0 : index
    %7 = vector.load %arg8[%c0_2, %c0_3] : memref<8x128xf32, #tpu.memory_space<vmem>>, vector<8x128xf32>
    %c0_4 = arith.constant 0 : index
    %c0_5 = arith.constant 0 : index
    %8 = vector.load %arg4[%c0_4, %c0_5] : memref<128x128xbf16, #tpu.memory_space<vmem>>, vector<128x128xbf16>
    %cst = arith.constant dense<0.000000e+00> : vector<8x128xf32>
    %9 = tpu.matmul %4, %8, %cst {dimension_numbers = #tpu.dot_dimension_numbers<[1], [0], [0], [1], [0, 0, 1, 1], [], []>} : vector<8x128xbf16>, vector<128x128xbf16>, vector<8x128xf32> -> vector<8x128xf32>
    %10 = arith.addf %7, %9 : vector<8x128xf32>
    %c0_6 = arith.constant 0 : index
    %c0_7 = arith.constant 0 : index
    %11 = vector.load %arg8[%c0_6, %c0_7] : memref<8x128xf32, #tpu.memory_space<vmem>>, vector<8x128xf32>
    tpu.vector_store %arg8[%c0_6, %c0_7], %10 {strides = array<i32>} : memref<8x128xf32, #tpu.memory_space<vmem>>, vector<8x128xf32>,
    %c0_8 = arith.constant 0 : index
    %c0_9 = arith.constant 0 : index
    %12 = vector.load %arg9[%c0_8, %c0_9] : memref<8x128xf32, #tpu.memory_space<vmem>>, vector<8x128xf32>
    %c0_10 = arith.constant 0 : index
    %c0_11 = arith.constant 0 : index
    %13 = vector.load %arg5[%c0_10, %c0_11] : memref<128x128xbf16, #tpu.memory_space<vmem>>, vector<128x128xbf16>
    %cst_12 = arith.constant dense<0.000000e+00> : vector<8x128xf32>
    %14 = tpu.matmul %6, %13, %cst_12 {dimension_numbers = #tpu.dot_dimension_numbers<[1], [0], [0], [1], [0, 0, 1, 1], [], []>} : vector<8x128xbf16>, vector<128x128xbf16>, vector<8x128xf32> -> vector<8x128xf32>
    %15 = arith.addf %12, %14 : vector<8x128xf32>
    %c0_13 = arith.constant 0 : index
    %c0_14 = arith.constant 0 : index
    %16 = vector.load %arg9[%c0_13, %c0_14] : memref<8x128xf32, #tpu.memory_space<vmem>>, vector<8x128xf32>
    tpu.vector_store %arg9[%c0_13, %c0_14], %15 {strides = array<i32>} : memref<8x128xf32, #tpu.memory_space<vmem>>, vector<8x128xf32>,
    %c0_i32_15 = arith.constant 0 : i32
    %17 = arith.cmpi eq, %arg2, %c0_i32_15 : i32
    %18 = arith.extui %17 : i1 to i32
    %c0_i32_16 = arith.constant 0 : i32
    %19 = arith.cmpi ne, %18, %c0_i32_16 : i32
    scf.if %19 {
      %c0_17 = arith.constant 0 : index
      %c0_18 = arith.constant 0 : index
      %20 = vector.load %arg6[%c0_17, %c0_18] : memref<3x128xf32, #tpu.memory_space<vmem>>, vector<1x128xf32>
      %c1 = arith.constant 1 : index
      %c0_19 = arith.constant 0 : index
      %21 = vector.load %arg6[%c1, %c0_19] : memref<3x128xf32, #tpu.memory_space<vmem>>, vector<1x128xf32>
      %c2 = arith.constant 2 : index
      %c0_20 = arith.constant 0 : index
      %22 = vector.load %arg6[%c2, %c0_20] : memref<3x128xf32, #tpu.memory_space<vmem>>, vector<1x128xf32>
      %c0_21 = arith.constant 0 : index
      %c0_22 = arith.constant 0 : index
      %23 = vector.load %arg8[%c0_21, %c0_22] : memref<8x128xf32, #tpu.memory_space<vmem>>, vector<8x128xf32>
      %24 = vector.broadcast %20 : vector<1x128xf32> to vector<8x128xf32>
      %25 = arith.addf %23, %24 : vector<8x128xf32>
      %c0_23 = arith.constant 0 : index
      %c0_24 = arith.constant 0 : index
      %26 = vector.load %arg9[%c0_23, %c0_24] : memref<8x128xf32, #tpu.memory_space<vmem>>, vector<8x128xf32>
      %27 = vector.broadcast %21 : vector<1x128xf32> to vector<8x128xf32>
      %28 = arith.addf %26, %27 : vector<8x128xf32>
      %29 = math.sqrt %28 : vector<8x128xf32>
      %30 = vector.broadcast %22 : vector<1x128xf32> to vector<8x128xf32>
      %31 = arith.mulf %29, %30 : vector<8x128xf32>
      %32 = arith.addf %31, %25 : vector<8x128xf32>
      %c0_25 = arith.constant 0 : index
      %c0_26 = arith.constant 0 : index
      %33 = vector.load %arg7[%c0_25, %c0_26] : memref<8x128xf32, #tpu.memory_space<vmem>>, vector<8x128xf32>
      tpu.vector_store %arg7[%c0_25, %c0_26], %32 {strides = array<i32>} : memref<8x128xf32, #tpu.memory_space<vmem>>, vector<8x128xf32>,
    } else {
    }
    return
  }
  func.func @transform_0(%arg0: i32, %arg1: i32, %arg2: i32) -> (i32, i32) {
    %c0_i32 = arith.constant 0 : i32
    return %arg0, %arg2 : i32, i32
  }
  func.func @transform_1(%arg0: i32, %arg1: i32, %arg2: i32) -> (i32, i32) {
    %c0_i32 = arith.constant 0 : i32
    return %arg2, %arg1 : i32, i32
  }
  func.func @transform_2(%arg0: i32, %arg1: i32, %arg2: i32) -> (i32, i32) {
    %c0_i32 = arith.constant 0 : i32
    return %arg2, %arg1 : i32, i32
  }
  func.func @transform_3(%arg0: i32, %arg1: i32, %arg2: i32) -> (i32, i32) {
    %c0_i32 = arith.constant 0 : i32
    %c0_i32_0 = arith.constant 0 : i32
    return %c0_i32, %arg1 : i32, i32
  }
  func.func @transform_4(%arg0: i32, %arg1: i32, %arg2: i32) -> (i32, i32) {
    %c0_i32 = arith.constant 0 : i32
    return %arg0, %arg1 : i32, i32
  }
}

</mosaic_0001>

<bundles_post_ra>
// kernel: tpu_custom_call.1
= control target key start
LH: loop header
LB: loop body
LE: loop exit
PB: predicated region body
PF: predicated region fallthrough
CT: control target
= control target key end

     0   :  { %9 = vsyncpa [#allocation5], 0  ;;  %s573_s0 = inlined_call_operand.hbm [shape: f32[8,128], index: 0, kind: input, shape index: {}]   ;;  %s574_s1 = inlined_call_operand.hbm [shape: bf16[128,128], index: 1, kind: input, shape index: {}]   ;;  %s575_s2 = inlined_call_operand.hbm [shape: bf16[128,128], index: 2, kind: input, shape index: {}]   ;;  %s576_s3 = inlined_call_operand.vmem [shape: f32[3,128], index: 3, kind: input, shape index: {}]   ;;  %s577_s4 = inlined_call_operand.hbm [shape: f32[8,128], index: 4, kind: output, shape index: {}]  }
   0x1   :  { %10 = vsyncpa [#allocation8], 0 }
   0x2   :  { %11 = vsyncpa [#allocation6], 0  ;;  %s519_s15 = smov [#allocation7]  }
   0x3   :  { %s27_s16 = sshll.u32 %s519_s15, 4  ;;  %s28_s16 = int_to_ptr.vmem [resolvable:$true] %s27_s16 }
   0x4   :  { %s441_s17 = scalar_lea.vmem %s28_s16, 1024  ;;  %p446_p1 = scmp.lt.s32.totalorder %s28_s16, %s28_s16 }
   0x5   :  { %p442_p0 = scmp.ne.s32.totalorder %s28_s16, %s441_s17  ;;  %p447_p2 = scmp.lt.s32.totalorder %s441_s17, %s441_s17 }
   0x7   :  { %p448_p3 = por %p447_p2, %p446_p1 }
   0x9   :  { %p449_p4 = pnand %p448_p3, %p442_p0 }
   0xb   :  { %452 = shalt.err (!%p449_p4)
}
   0xc   :  { %s520_s18 = smov 64   ;;  %s521_s19 = smov 4  }
   0xd   :  { %33 = dma.hbm_to_vmem [thread:$0]  %s574_s1, 1024, %s28_s16, [#allocation8], %s520_s18, %s520_s18, %s521_s19  }
   0xe   :  { %s522_s22 = smov [#allocation4]   ;;  %s523_s24 = smov [#allocation9]  }
   0xf   :  { %s18_s23 = sshll.u32 %s522_s22, 4  ;;  %s39_s25 = sshll.u32 %s523_s24, 4  ;;  %s19_s23 = int_to_ptr.vmem [resolvable:$true] %s18_s23  ;;  %s40_s25 = int_to_ptr.vmem [resolvable:$true] %s39_s25 }
  0x10   :  { %s461_s26 = scalar_lea.vmem %s19_s23, 128  ;;  %p466_p6 = scmp.lt.s32.totalorder %s19_s23, %s19_s23 }
  0x11   :  { %p462_p5 = scmp.ne.s32.totalorder %s19_s23, %s461_s26  ;;  %p467_p7 = scmp.lt.s32.totalorder %s461_s26, %s461_s26 }
  0x13   :  { %p468_p8 = por %p467_p7, %p466_p6 }
  0x15   :  { %p469_p9 = pnand %p468_p8, %p462_p5 }
  0x17   :  { %472 = shalt.err (!%p469_p9)
}
  0x18   :  { %21 = dma.hbm_to_vmem [thread:$0]  %s573_s0, 128, %s19_s23, [#allocation5]  }
  0x19   :  { %s481_s29 = scalar_lea.vmem %s40_s25, 1024  ;;  %p486_p11 = scmp.lt.s32.totalorder %s40_s25, %s40_s25 }
  0x1a   :  { %p482_p10 = scmp.ne.s32.totalorder %s40_s25, %s481_s29  ;;  %p487_p12 = scmp.lt.s32.totalorder %s481_s29, %s481_s29 }
  0x1c   :  { %p488_p13 = por %p487_p12, %p486_p11 }
  0x1e   :  { %p489_p0 = pnand %p488_p13, %p482_p10 }
  0x20   :  { %492 = shalt.err (!%p489_p0)
}
  0x21   :  { %45 = dma.hbm_to_vmem [thread:$0]  %s575_s2, 1024, %s40_s25, [#allocation8], %s520_s18, %s520_s18, %s521_s19  }
  0x22   :  { %513 = dma.done.wait [#allocation5], 128  }
  0x23   :  { %514 = vsyncadd [#allocation5], 4294967168 }
  0x24   :  { %515 = dma.done.wait [#allocation8], 2048  }
  0x25   :  { %516 = vsyncadd [#allocation8], 4294965248  ;;  %v524_v0 = vmov 0.0   ;;  %vm525_vm0 = vmmov 0   ;;  %v415_v1 = vld [vmem:[#allocation9 + $0x38] sm:$0xff]   ;;  %v416_v2 = vld [vmem:[#allocation9 + $0x30] sm:$0xff]  }
  0x26   :  { %387 = vmatprep.subr.bf16.mxu1 %v524_v0  ;;  %367 = vmatprep.subr.bf16.mxu0 %v524_v0  ;;  %v419_v3 = vld [vmem:[#allocation7 + $0x38] sm:$0xff]   ;;  %v417_v4 = vld [vmem:[#allocation9 + $0x28] sm:$0xff]   ;;  %v421_v5 = vld [vmem:[#allocation7 + $0x30] sm:$0xff]   ;;  %s526_s9 = smov [#allocation10]  }
  0x27   :  { %403 = vmatprep.mubr.msk.bf16.mxu1 %vm525_vm0, %v524_v0  ;;  %383 = vmatprep.mubr.msk.bf16.mxu0 %vm525_vm0, %v524_v0  ;;  %v418_v6 = vld [vmem:[#allocation9 + $0x20] sm:$0xff]   ;;  %v423_v7 = vld [vmem:[#allocation7 + $0x28] sm:$0xff]   ;;  %v420_v8 = vld [vmem:[#allocation9 + $0x18] sm:$0xff]   ;;  %s320_s10 = sshll.u32 %s526_s9, 4  ;;  %s321_s10 = int_to_ptr.vmem [resolvable:$true] %s320_s10 }
  0x28   :  { %388 = vmatpush3.bf16.msra.mxu1 %v415_v1  ;;  %368 = vmatpush3.bf16.msra.mxu0 %v419_v3  ;;  %v425_v9 = vld [vmem:[#allocation7 + $0x20] sm:$0xff]   ;;  %v422_v10 = vld [vmem:[#allocation9 + $0x10] sm:$0xff]   ;;  %v427_v11 = vld [vmem:[#allocation7 + $0x18] sm:$0xff]   ;;  %s493_s11 = scalar_lea.vmem %s321_s10, 128  ;;  %p498_p2 = scmp.lt.s32.totalorder %s321_s10, %s321_s10 }
  0x29   :  { %389 = vmatprep.subr.bf16.mxu1 %v524_v0  ;;  %369 = vmatprep.subr.bf16.mxu0 %v524_v0  ;;  %v424_v12 = vld [vmem:[#allocation9 + $0x8] sm:$0xff]   ;;  %v64_v13 = vld [vmem:[#allocation4] sm:$0xff]  ;;  %v428_v14 = vld [vmem:[#allocation7 + $0x10] sm:$0xff]   ;;  %p494_p1 = scmp.ne.s32.totalorder %s321_s10, %s493_s11  ;;  %p499_p3 = scmp.lt.s32.totalorder %s493_s11, %s493_s11 }
  0x2a   :  { %v66_v15 = vmul.f32 %v64_v13, %v64_v13  ;;  %v426_v16 = vld [vmem:[#allocation9] sm:$0xff]   ;;  %v429_v17 = vld [vmem:[#allocation7 + $0x8] sm:$0xff]   ;;  %v65_v20 = vpack.c.bf16 %v64_v13, %v64_v13  ;;  %v347_v21 = vld [vmem:[%s576_s3 + $0x1] ss:$0 sm:$0xff] }
  0x2b   :  { %v430_v19 = vld [vmem:[#allocation7] sm:$0xff]   ;;  %v346_v32 = vld [vmem:[%s576_s3] ss:$0 sm:$0xff]  ;;  %v348_v34 = vld [vmem:[%s576_s3 + $0x2] ss:$0 sm:$0xff]  ;;  %p500_p4 = por %p499_p3, %p498_p2 }
  0x2c   :  { %390 = vmatpush3.bf16.msra.mxu1 %v416_v2  ;;  %370 = vmatpush3.bf16.msra.mxu0 %v421_v5  ;;  %v67_v18 = vpack.c.bf16 %v66_v15, %v66_v15 }
  0x2d   :  { %391 = vmatprep.subr.bf16.mxu1 %v524_v0  ;;  %371 = vmatprep.subr.bf16.mxu0 %v524_v0  ;;  %p501_p5 = pnand %p500_p4, %p494_p1 }
  0x30   :  { %392 = vmatpush3.bf16.msra.mxu1 %v417_v4  ;;  %372 = vmatpush3.bf16.msra.mxu0 %v423_v7 }
  0x31   :  { %393 = vmatprep.subr.bf16.mxu1 %v524_v0  ;;  %373 = vmatprep.subr.bf16.mxu0 %v524_v0 }
  0x34   :  { %394 = vmatpush3.bf16.msra.mxu1 %v418_v6  ;;  %374 = vmatpush3.bf16.msra.mxu0 %v425_v9 }
  0x35   :  { %395 = vmatprep.subr.bf16.mxu1 %v524_v0  ;;  %375 = vmatprep.subr.bf16.mxu0 %v524_v0 }
  0x38   :  { %396 = vmatpush3.bf16.msra.mxu1 %v420_v8  ;;  %376 = vmatpush3.bf16.msra.mxu0 %v427_v11 }
  0x39   :  { %397 = vmatprep.subr.bf16.mxu1 %v524_v0  ;;  %377 = vmatprep.subr.bf16.mxu0 %v524_v0 }
  0x3c   :  { %398 = vmatpush3.bf16.msra.mxu1 %v422_v10  ;;  %378 = vmatpush3.bf16.msra.mxu0 %v428_v14 }
  0x3d   :  { %399 = vmatprep.subr.bf16.mxu1 %v524_v0  ;;  %379 = vmatprep.subr.bf16.mxu0 %v524_v0 }
  0x40   :  { %400 = vmatpush3.bf16.msra.mxu1 %v424_v12  ;;  %380 = vmatpush3.bf16.msra.mxu0 %v429_v17 }
  0x41   :  { %401 = vmatprep.subr.bf16.mxu1 %v524_v0  ;;  %381 = vmatprep.subr.bf16.mxu0 %v524_v0 }
  0x44   :  { %402 = vmatpush3.bf16.msra.mxu1 %v426_v16  ;;  %382 = vmatpush3.bf16.msra.mxu0 %v430_v19 }
  0x47   :  { %404 = vmatmul.mubr.bf16.vlgmr.msra.gmra.mxu1 %v67_v18  ;;  %384 = vmatmul.mubr.bf16.vlgmr.msra.gmra.mxu0 %v65_v20 }
 0x107   :  { %v274_v22 = vpop.f32.mrf.mxu1  ;;  %v167_v26 = vpop.f32.mrf.mxu0 }
 0x108   :  { %v299_v23 = vadd.f32 %v347_v21, %v274_v22  ;;  %v293_v36 = vadd.f32 %v346_v32, %v167_v26 }
 0x109   :  { %v405_v24 = vpop.f32.mrf.mxu1  ;;  %v385_v28 = vpop.f32.mrf.mxu0 }
 0x10a   :  { %431 = vrsqrt.f32 %v299_v23  ;;  %vm302_vm1 = vcmp.eq.f32.partialorder %v299_v23, inf  ;;  %v305_v35 = vand.u32 2147483648, %v299_v23  ;;  %vm304_vm2 = vcmp.eq.f32.partialorder %v299_v23, 0.0 }
 0x10b   :  { %v277_v25 = vpop.f32.mrf.mxu1  ;;  %v170_v29 = vpop.f32.mrf.mxu0 }
 0x10d   :  { %v406_v27 = vpop.f32.mrf.mxu1  ;;  %v386_v30 = vpop.f32.mrf.mxu0 }
 0x117   :  { %v432_v31 = vpop.eup %431 }
 0x118   :  { %v301_v33 = vmul.f32 %v432_v31, %v299_v23 }
 0x11a   :  { %v303_v37 = vsel %vm302_vm1, %v299_v23, %v301_v33 }
 0x11b   :  { %v306_v38 = vsel %vm304_vm2, %v305_v35, %v303_v37 }
 0x11c   :  { %v311_v39 = vmul.f32 %v348_v34, %v306_v38 }
 0x11e   :  { %v312_v40 = vadd.f32 %v311_v39, %v293_v36 }
 0x120   :  { %313 = vst [vmem:[#allocation10] sm:$0xff] %v312_v40 }
 0x121   :  { %504 = shalt.err (!%p501_p5)
}
 0x122   :  { %323 = dma.vmem_to_hbm [thread:$0]  %s321_s10, 128, %s577_s4, [#allocation6]  }
 0x123   :  { %517 = dma.done.wait [#allocation6], 128  }
 0x124   :  { %518 = vsyncadd [#allocation6], 4294967168 }
 0x125   :  { %327 = vsyncpa [#allocation5], 1 }
 0x126   :  { %328 = vsyncpa [#allocation8], 1 }
 0x127   :  { %329 = vsyncpa [#allocation6], 1 }

</bundles_post_ra>
